<compile_context>
chip_gen: v7x
topology: tpu7x:2x2x1
jax: 0.10.0
libtpu: 0.0.40
codegen_flags: <defaults>
</compile_context>

<pallas_src>
import functools

import numpy as np
import jax
import jax.numpy as jnp
from jax.experimental import pallas as pl
from jax.experimental.pallas import tpu as pltpu


def _build_pe(d_model: int, max_len: int = 5000) -> jnp.ndarray:
    """Sinusoidal table, identical math to the PyTorch __init__ (kept in f32)."""
    pos = np.arange(0, max_len, dtype=np.float32)[:, None]                  # (max_len, 1)
    div = np.exp(np.arange(0, d_model, 2, dtype=np.float32)
                 * -(np.log(10000.0) / d_model))                            # (d_model/2,)
    pe = np.zeros((max_len, d_model), dtype=np.float32)
    pe[:, 0::2] = np.sin(pos * div)
    pe[:, 1::2] = np.cos(pos * div)
    return jnp.asarray(pe)


def _cdiv(a: int, b: int) -> int:
    return -(-a // b)


def _round_up(a: int, b: int) -> int:
    return _cdiv(a, b) * b


def _pos_enc_kernel_flat(x_ref, pe_ref, o_ref, *, batch: int, d_model: int):
    # x_ref / o_ref: (TS, B*D) lane-dense tiles; pe_ref: (TS, D) float32.
    # D % 128 == 0 => every batch slice is lane-aligned. Add in f32, cast on store.
    # No (TS, B*D) VMEM temp is materialized (old jnp.tile removed).
    pe = pe_ref[...]
    for b in range(batch):
        sl = slice(b * d_model, (b + 1) * d_model)
        o_ref[:, sl] = (x_ref[:, sl].astype(jnp.float32) + pe).astype(o_ref.dtype)


def _pos_enc_kernel_3d(x_ref, pe_ref, o_ref):
    # Fallback for D not a multiple of 128: x_ref/o_ref are (TS, B, D), pe_ref is
    # (TS, D) f32; broadcast pe across the batch (sublane) axis.
    # TODO(synk): tiny B*D (< 128) still pays masked partial stores; lane-packing
    # the flattened array is not worth it at these sizes.
    o_ref[...] = (x_ref[...].astype(jnp.float32)
                  + pe_ref[...][:, None, :]).astype(o_ref.dtype)


def positional_encoding(x: jnp.ndarray, pe: jnp.ndarray,
                        *, target_tile_bytes: int = 4 * 1024 * 1024,
                        donate_x: bool = False) -> jnp.ndarray:
    """x: (S, B, D); pe: (max_len, D) f32 table. Returns x + pe[:S][:, None, :]."""
    S, B, D = x.shape
    max_len = pe.shape[0]
    if S > max_len:
        raise ValueError(f"sequence length {S} exceeds positional table length {max_len}")
    if pe.dtype != jnp.float32:
        pe = pe.astype(jnp.float32)

    itemsize = x.dtype.itemsize
    # Tile-height granularity matches packed sublane rows: 8 (32-bit), 16 (16-bit), 32 (8-bit).
    g = 8 * max(1, 4 // itemsize)

    # --- seq-axis tile: biggest multiple of g giving ~target_tile_bytes per x tile ---
    row_bytes = B * D * itemsize
    ts = max(g, (target_tile_bytes // max(row_bytes, 1)) // g * g)
    if S > g:
        # Keep >= 2 tiles so the ("parallel",) seq axis can split across both v7x TCs.
        ts = min(ts, _round_up(_cdiv(S, 2), g))
    ts = min(ts, _round_up(S, g))
    grid = (_cdiv(S, ts),)

    # Explicit VMEM budget: x & out tiles double-buffered, pe tiles, f32 temps, slack.
    tile_bytes = ts * B * D * itemsize
    pe_tile_bytes = ts * D * 4
    vmem_needed = 4 * tile_bytes + 2 * pe_tile_bytes + 2 * ts * B * D * 4 + (2 << 20)
    vmem_limit = int(min(max(vmem_needed, 32 << 20), 48 << 20))  # <= 48 MiB fits v7x too

    cost = pl.CostEstimate(
        flops=S * B * D,
        transcendentals=0,
        bytes_accessed=2 * S * B * D * itemsize + S * D * 4,
    )
    common = dict(
        compiler_params=pltpu.CompilerParams(
            dimension_semantics=("parallel",),
            vmem_limit_bytes=vmem_limit,
        ),
        cost_estimate=cost,
        input_output_aliases=({0: 0} if donate_x else {}),
    )

    if D % 128 == 0:
        # Lane-dense path: view x as (S, B*D); contiguous => free reshape.
        x2 = x.reshape(S, B * D)
        out2 = pl.pallas_call(
            functools.partial(_pos_enc_kernel_flat, batch=B, d_model=D),
            out_shape=jax.ShapeDtypeStruct((S, B * D), x.dtype),
            grid_spec=pltpu.PrefetchScalarGridSpec(
                num_scalar_prefetch=0,
                grid=grid,
                in_specs=[
                    pl.BlockSpec((ts, B * D), lambda i: (i, 0)),   # x tile (lane-dense)
                    pl.BlockSpec((ts, D), lambda i: (i, 0)),       # pe rows (full table in HBM)
                ],
                out_specs=pl.BlockSpec((ts, B * D), lambda i: (i, 0)),
            ),
            **common,
        )(x2, pe)
        # TODO(synk): biggest remaining win is fusing this add into the adjacent
        # embedding-scale / first-projection kernel; a standalone broadcast-add is
        # bound by one full HBM read + write of x.
        return out2.reshape(S, B, D)

    # Fallback path (D not a multiple of 128): keep x 3-D and broadcast pe over batch.
    return pl.pallas_call(
        _pos_enc_kernel_3d,
        out_shape=jax.ShapeDtypeStruct((S, B, D), x.dtype),
        grid_spec=pltpu.PrefetchScalarGridSpec(
            num_scalar_prefetch=0,
            grid=grid,
            in_specs=[
                pl.BlockSpec((ts, B, D), lambda i: (i, 0, 0)),
                pl.BlockSpec((ts, D), lambda i: (i, 0)),
            ],
            out_specs=pl.BlockSpec((ts, B, D), lambda i: (i, 0, 0)),
        ),
        **common,
    )(x, pe)


if __name__ == "__main__":
    # Small case (exercises the 3-D fallback path, D % 128 != 0).
    d_model, seq_len, batch, max_len = 32, 8, 2, 64
    pe = _build_pe(d_model, max_len=max_len)
    x = jax.random.normal(jax.random.PRNGKey(0), (seq_len, batch, d_model), dtype=jnp.float32)
    out = jax.block_until_ready(positional_encoding(x, pe))
    ref = x + pe[:seq_len][:, None, :]
    np.testing.assert_allclose(np.asarray(out), np.asarray(ref), rtol=1e-6, atol=1e-6)

    # Lane-dense path (D % 128 == 0) with a ragged last tile and a 2-block grid.
    d2, s2, b2 = 128, 24, 2
    pe2 = _build_pe(d2, max_len=128)
    x2 = jax.random.normal(jax.random.PRNGKey(1), (s2, b2, d2), dtype=jnp.float32)
    out2 = jax.block_until_ready(positional_encoding(x2, pe2))
    ref2 = x2 + pe2[:s2][:, None, :]
    np.testing.assert_allclose(np.asarray(out2), np.asarray(ref2), rtol=1e-6, atol=1e-6)

    print("KERNEL_OK")
</pallas_src>

<mosaic_0001>
module attributes {stable_mosaic.version = 11 : i64} {
  func.func @_pos_enc_kernel_3d(%arg0: i32, %arg1: memref<8x2x32xf32, #tpu.memory_space<vmem>>, %arg2: memref<8x32xf32, #tpu.memory_space<vmem>>, %arg3: memref<8x2x32xf32, #tpu.memory_space<vmem>>) attributes {dimension_semantics = [#tpu.dimension_semantics<parallel>], iteration_bounds = array<i64: 1>, scalar_prefetch = 0 : i64, scratch_operands = 0 : i64, tpu.core_type = #tpu.core_type<tc>, window_params = [{transform_indices = @transform_0, window_bounds = array<i64: 8, 2, 32>}, {transform_indices = @transform_1, window_bounds = array<i64: 8, 32>}, {transform_indices = @transform_2, window_bounds = array<i64: 8, 2, 32>}]} {
    %c0 = arith.constant 0 : index
    %c0_0 = arith.constant 0 : index
    %c0_1 = arith.constant 0 : index
    %0 = vector.load %arg1[%c0, %c0_0, %c0_1] : memref<8x2x32xf32, #tpu.memory_space<vmem>>, vector<8x2x32xf32>
    %c0_2 = arith.constant 0 : index
    %c0_3 = arith.constant 0 : index
    %1 = vector.load %arg2[%c0_2, %c0_3] : memref<8x32xf32, #tpu.memory_space<vmem>>, vector<8x32xf32>
    %2 = vector.shape_cast %1 : vector<8x32xf32> to vector<8x1x32xf32>
    %3 = vector.broadcast %2 : vector<8x1x32xf32> to vector<8x2x32xf32>
    %4 = arith.addf %0, %3 : vector<8x2x32xf32>
    %c0_4 = arith.constant 0 : index
    %c0_5 = arith.constant 0 : index
    %c0_6 = arith.constant 0 : index
    %5 = vector.load %arg3[%c0_4, %c0_5, %c0_6] : memref<8x2x32xf32, #tpu.memory_space<vmem>>, vector<8x2x32xf32>
    tpu.vector_store %arg3[%c0_4, %c0_5, %c0_6], %4 {strides = array<i32>} : memref<8x2x32xf32, #tpu.memory_space<vmem>>, vector<8x2x32xf32>,
    return
  }
  func.func @transform_0(%arg0: i32) -> (i32, i32, i32) {
    %c0_i32 = arith.constant 0 : i32
    %c0_i32_0 = arith.constant 0 : i32
    %c0_i32_1 = arith.constant 0 : i32
    return %arg0, %c0_i32, %c0_i32_0 : i32, i32, i32
  }
  func.func @transform_1(%arg0: i32) -> (i32, i32) {
    %c0_i32 = arith.constant 0 : i32
    %c0_i32_0 = arith.constant 0 : i32
    return %arg0, %c0_i32 : i32, i32
  }
  func.func @transform_2(%arg0: i32) -> (i32, i32, i32) {
    %c0_i32 = arith.constant 0 : i32
    %c0_i32_0 = arith.constant 0 : i32
    %c0_i32_1 = arith.constant 0 : i32
    return %arg0, %c0_i32, %c0_i32_0 : i32, i32, i32
  }
}

</mosaic_0001>

<bundles_post_ra>
// kernel: tpu_custom_call.1
= control target key start
LH: loop header
LB: loop body
LE: loop exit
PB: predicated region body
PF: predicated region fallthrough
CT: control target
= control target key end

     0   :  { %v26_v1 = vlaneseq  ;;  %v172_v2 = vmov 1966171168   ;;  %s238_s0 = inlined_call_operand.vmem [shape: f32[8,2,32], index: 0, kind: input, shape index: {}]   ;;  %s239_s1 = inlined_call_operand.vmem [shape: f32[64,32], index: 1, kind: input, shape index: {}]   ;;  %s240_s2 = inlined_call_operand.hbm [shape: f32[8,2,32], index: 2, kind: output, shape index: {}]  }
   0x1   :  { %v20_v0 = vld [vmem:[%s239_s1] sm:$0xff]  ;;  %v24_v3 = vunpack.c.l.s4 %v172_v2 }
   0x2   :  { %v27_v4 = vshrl.u32 %v26_v1, 7  ;;  %v22_v6 = vcombine.high %v20_v0, %v20_v0 }
   0x3   :  { %v25_v5 = vunpack.c.0.s8 %v24_v3 }
   0x4   :  { %7 = vsyncpa [#allocation3], 0  ;;  %v73_v9 = vsub.s32 0, %v27_v4  ;;  %v12_v15 = vld [vmem:[%s238_s0] sm:$0x3]  ;;  %vm119_vm0 = vcmask 254976  }
   0x5   :  { %v28_v7 = vsub.s32 %v25_v5, %v27_v4  ;;  %v16_v19 = vld [vmem:[%s238_s0 + $0x8] sm:$0x3]  ;;  %v13_v21 = vld [vmem:[%s238_s0 + $0x2] sm:$0x3]  ;;  %v14_v22 = vld [vmem:[%s238_s0 + $0x4] sm:$0x3] }
   0x6   :  { %v17_v29 = vld [vmem:[%s238_s0 + $0xa] sm:$0x3]  ;;  %v18_v30 = vld [vmem:[%s238_s0 + $0xc] sm:$0x3]  ;;  %v15_v31 = vld [vmem:[%s238_s0 + $0x6] sm:$0x3] }
   0x7   :  { %v29_v8 = vrot.slane %v20_v0, %v28_v7  ;;  %v36_v10 = vrot.slane %v22_v6, %v28_v7  ;;  %v19_v39 = vld [vmem:[%s238_s0 + $0xe] sm:$0x3]  ;;  %s173_s26 = smov [#allocation2]  }
   0x8   :  { %s133_s27 = sshll.u32 %s173_s26, 4  ;;  %s134_s27 = int_to_ptr.vmem [resolvable:$true] %s133_s27 }
   0x9   :  { %v45_v11 = vrot.slane %v29_v8, %v28_v7  ;;  %v37_v12 = vcombine.high %v29_v8, %v29_v8  ;;  %v52_v13 = vrot.slane %v36_v10, %v28_v7  ;;  %v38_v14 = vcombine.high %v36_v10, %v36_v10  ;;  %s148_s0 = scalar_lea.vmem %s134_s27, 256  ;;  %p153_p1 = scmp.lt.s32.totalorder %s134_s27, %s134_s27 }
   0xa   :  { %p149_p0 = scmp.ne.s32.totalorder %s134_s27, %s148_s0  ;;  %p154_p2 = scmp.lt.s32.totalorder %s148_s0, %s148_s0 }
   0xb   :  { %v74_v16 = vrot.slane %v45_v11, %v73_v9  ;;  %v59_v17 = vrot.slane %v37_v12, %v28_v7  ;;  %v67_v18 = vcombine.high %v45_v11, %v45_v11  ;;  %v90_v20 = vrot.slane %v52_v13, %v73_v9 }
   0xc   :  { %v66_v23 = vrot.slane %v38_v14, %v28_v7  ;;  %v68_v24 = vcombine.high %v52_v13, %v52_v13  ;;  %p155_p3 = por %p154_p2, %p153_p1 }
   0xd   :  { %v111_v25 = vadd.f32 %v74_v16, %v12_v15  ;;  %v78_v26 = vrot.slane %v59_v17, %v73_v9  ;;  %v82_v27 = vrot.slane %v67_v18, %v73_v9  ;;  %v69_v28 = vcombine.high %v59_v17, %v59_v17 }
   0xe   :  { %v115_v32 = vadd.f32 %v90_v20, %v16_v19  ;;  %v94_v33 = vrot.slane %v66_v23, %v73_v9  ;;  %v98_v34 = vrot.slane %v68_v24, %v73_v9  ;;  %v70_v35 = vcombine.high %v66_v23, %v66_v23  ;;  %p156_p4 = pnand %p155_p3, %p149_p0 }
   0xf   :  { %120 = vst.msk [vmem:[#allocation2] sm:$0x3] %vm119_vm0, %v111_v25  ;;  %v112_v36 = vadd.f32 %v78_v26, %v13_v21  ;;  %v113_v37 = vadd.f32 %v82_v27, %v14_v22  ;;  %v86_v38 = vrot.slane %v69_v28, %v73_v9 }
  0x10   :  { %124 = vst.msk [vmem:[#allocation2 + $0x8] sm:$0x3] %vm119_vm0, %v115_v32  ;;  %v116_v40 = vadd.f32 %v94_v33, %v17_v29  ;;  %v117_v41 = vadd.f32 %v98_v34, %v18_v30  ;;  %v102_v42 = vrot.slane %v70_v35, %v73_v9 }
  0x11   :  { %121 = vst.msk [vmem:[#allocation2 + $0x2] sm:$0x3] %vm119_vm0, %v112_v36  ;;  %122 = vst.msk [vmem:[#allocation2 + $0x4] sm:$0x3] %vm119_vm0, %v113_v37  ;;  %v114_v43 = vadd.f32 %v86_v38, %v15_v31 }
  0x12   :  { %125 = vst.msk [vmem:[#allocation2 + $0xa] sm:$0x3] %vm119_vm0, %v116_v40  ;;  %126 = vst.msk [vmem:[#allocation2 + $0xc] sm:$0x3] %vm119_vm0, %v117_v41  ;;  %v118_v44 = vadd.f32 %v102_v42, %v19_v39 }
  0x13   :  { %123 = vst.msk [vmem:[#allocation2 + $0x6] sm:$0x3] %vm119_vm0, %v114_v43 }
  0x14   :  { %127 = vst.msk [vmem:[#allocation2 + $0xe] sm:$0x3] %vm119_vm0, %v118_v44 }
  0x15   :  { %159 = shalt.err (!%p156_p4)
}
  0x16   :  { %s160_s30 = scalar_lea.hbm %s240_s2, 256 }
  0x17   :  { %p161_p5 = scmp.ne.s32.totalorder %s240_s2, %s160_s30  ;;  %p164_p6 = scmp.lt.u32.totalorder %s160_s30, %s240_s2 }
  0x19   :  { %p166_p7 = pnand %p164_p6, %p161_p5 }
  0x1b   :  { %169 = shalt.err (!%p166_p7)
}
  0x1c   :  { %s174_s7 = smov 32   ;;  %s175_s8 = smov 2  }
  0x1d   :  { %139 = dma.vmem_to_hbm [thread:$0]  %s134_s27, 256, %s240_s2, [#allocation3], %s174_s7, %s174_s7, %s175_s8  }
  0x1e   :  { %170 = dma.done.wait [#allocation3], 256  }
  0x1f   :  { %171 = vsyncadd [#allocation3], 4294967040 }
  0x20   :  { %143 = vsyncpa [#allocation3], 1 }

</bundles_post_ra>
